<compile_context>
chip_gen: v5e
topology: v5e:2x2
jax: 0.10.0
libtpu: 0.0.40
codegen_flags: <defaults>
</compile_context>

<pallas_src>
import jax
import jax.numpy as jnp
from jax.experimental import pallas as pl
from jax.experimental.pallas import tpu as pltpu

BN_EPS = 1e-3  # the PyTorch module constructs BatchNorm2d(..., eps=0.001)


def policy_head_kernel(cp_ref, x_ref, wl_ref, bl_ref, o_ref):
    # cp_ref : SMEM (1, C+1)          [0, :C] = conv weight * BN scale, [0, C] = BN bias
    # x_ref  : VMEM (TILE_N, C*HW)    activations (source dtype), channel-major chunks
    # wl_ref : VMEM (HW, COL)         linear weight block (transposed, zero-padded cols)
    # bl_ref : VMEM (1, COL)          linear bias block (f32, zero-padded)
    # o_ref  : VMEM (TILE_N, COL)     padded logits block (f32)
    C = cp_ref.shape[1] - 1
    HW = wl_ref.shape[0]

    # 1x1 conv (folded BN scale): VPU weighted sum over lane-aligned channel
    # chunks.  4 independent partial accumulators keep the 4 VALU slots busy
    # instead of one serial C-deep dependency chain.
    n_acc = min(C, 4)
    acc = [x_ref[:, a * HW:(a + 1) * HW].astype(jnp.float32) * cp_ref[0, a]
           for a in range(n_acc)]
    for c in range(n_acc, C):
        a = c % n_acc
        acc[a] = acc[a] + x_ref[:, c * HW:(c + 1) * HW].astype(jnp.float32) * cp_ref[0, c]
    total = acc[0]
    for a in range(1, n_acc):
        total = total + acc[a]

    # BN bias + ReLU (Flatten is just the (TILE_N, HW) view).  Stays f32 so the
    # epilogue is identical on v5e (no bf16 VPU) and v6e/v7x.
    h = jnp.maximum(total + cp_ref[0, C], 0.0)

    # Linear on the MXU (operands in wl's dtype -- bf16 by default -- with f32
    # accumulate), f32 bias add.  Output stays f32; cast here if downstream
    # tolerates bf16 logits (halves output HBM writes on v6e/v7x).
    o_ref[...] = (
        jnp.dot(h.astype(wl_ref.dtype), wl_ref[...],
                preferred_element_type=jnp.float32)
        + bl_ref[...]
    ).astype(o_ref.dtype)


def prepare_policy_head_params(params, *, eps=BN_EPS, matmul_dtype=jnp.bfloat16):
    """One-time parameter prep: BN fold, transpose, lane-dense padding, casts.

    bf16 MXU operands are the default on ALL generations (v5e/v6e/v7x): the MXU
    takes bf16 natively everywhere and accumulation stays f32.
    """
    C = params["conv_w"].shape[1]
    HW_out, HW = params["lin_w"].shape            # (HW+1, HW)
    PAD = int(pl.cdiv(HW_out, 128) * 128)         # 257 -> 384 (lane-dense output)

    inv_std = 1.0 / jnp.sqrt(params["bn_var"] + eps)            # (1,)
    scale = params["bn_gamma"] * inv_std                        # (1,)
    bn_bias = params["bn_beta"] - params["bn_mean"] * scale     # (1,)

    wc_eff = params["conv_w"].reshape(C) * scale                # (C,)
    conv_params = jnp.concatenate([wc_eff, bn_bias]).reshape(1, C + 1)
    conv_params = conv_params.astype(jnp.float32)               # SMEM scalars

    wl_t = params["lin_w"].T.astype(matmul_dtype)               # (HW, HW+1)
    wl_pad = jnp.zeros((HW, PAD), matmul_dtype).at[:, :HW_out].set(wl_t)
    bl_pad = jnp.zeros((1, PAD), jnp.float32).at[:, :HW_out].set(
        params["lin_b"].astype(jnp.float32))

    return {
        "conv_params": conv_params,   # (1, C+1) f32
        "wl": wl_pad,                 # (HW, PAD)   matmul_dtype
        "bl": bl_pad,                 # (1, PAD)    f32
        "C": C, "HW": HW, "HW_out": HW_out, "PAD": PAD,
    }


def _dual_tensorcore_chip():
    """True on chips with 2 TensorCores per chip (v7x) -> column-parallel split."""
    try:
        return "v7" in jax.devices()[0].device_kind.lower()
    except Exception:
        return False


def policy_head_forward(x_nchw, prepped, *, col_parallel=None):
    N, C, H, W = x_nchw.shape
    HW, HW_out, PAD = prepped["HW"], prepped["HW_out"], prepped["PAD"]
    assert C == prepped["C"] and H * W == HW

    # NCHW -> (N, C*HW): a free reshape, no transpose, no dtype change.  Each
    # channel is a lane-aligned HW-wide chunk (HW=256 is a multiple of 128),
    # so no sublane padding and no strided channel slices in the kernel.
    x = x_nchw.reshape(N, C * HW)

    # Batch tiling: whole batch per step while small; 256-row tiles when large
    # (fills the 256-wide v6e/v7x MXU, amortizes per-step pipeline overhead;
    # on v5e each step simply makes two 128-row MXU passes).
    TILE_N = N if N <= 256 else 256
    n_batch_blocks = int(pl.cdiv(N, TILE_N))
    # No host-side batch padding: Pallas masks OOB rows of the ragged last
    # output block; garbage rows in the ragged input tail are harmless because
    # the kernel has no cross-row reduction.

    # With a single batch block, optionally split the output columns into
    # 128-wide 'parallel' blocks so a second TensorCore (v7x) gets work.
    if col_parallel is None:
        col_parallel = _dual_tensorcore_chip()
    if col_parallel and n_batch_blocks == 1 and PAD > 128:
        COL_TILE = 128
    else:
        COL_TILE = PAD
    n_col_blocks = PAD // COL_TILE

    out = pl.pallas_call(
        policy_head_kernel,
        out_shape=jax.ShapeDtypeStruct((N, PAD), jnp.float32),
        grid=(n_batch_blocks, n_col_blocks),
        in_specs=[
            # folded conv weights + BN bias: whole array, scalar memory
            pl.BlockSpec(memory_space=pltpu.MemorySpace.SMEM),
            # activations: tiled over the batch axis, constant across columns
            pl.BlockSpec((TILE_N, C * HW), lambda i, j: (i, 0)),
            # linear weight / bias: resident across batch steps, tiled by column
            pl.BlockSpec((HW, COL_TILE), lambda i, j: (0, j)),
            pl.BlockSpec((1, COL_TILE), lambda i, j: (0, j)),
        ],
        out_specs=pl.BlockSpec((TILE_N, COL_TILE), lambda i, j: (i, j)),
        compiler_params=pltpu.CompilerParams(
            dimension_semantics=("parallel", "parallel")),
    )(prepped["conv_params"], x, prepped["wl"], prepped["bl"])

    # Drop the lane-padding columns (HW_out=257 real logits out of PAD=384).
    return out[:, :HW_out]


def reference_forward(x_nchw, params):
    """Plain-JAX reference mirroring the PyTorch forward (eval-mode BN, eps=1e-3)."""
    N, C, H, W = x_nchw.shape
    conv = jnp.einsum("nchw,oc->nohw", x_nchw, params["conv_w"].reshape(1, C))
    scale = params["bn_gamma"] / jnp.sqrt(params["bn_var"] + BN_EPS)
    bn = (conv - params["bn_mean"][None, :, None, None]) * scale[None, :, None, None] \
         + params["bn_beta"][None, :, None, None]
    h = jnp.maximum(bn, 0.0).reshape(N, -1)                       # Flatten
    return h @ params["lin_w"].T + params["lin_b"]


def make_params(key, channels, board_size):
    hw = board_size * board_size
    k = jax.random.split(key, 6)
    return {
        "conv_w": 0.1 * jax.random.normal(k[0], (1, channels, 1, 1), jnp.float32),
        "bn_gamma": jnp.ones((1,), jnp.float32) * 1.1,
        "bn_beta": jnp.ones((1,), jnp.float32) * 0.05,
        "bn_mean": 0.1 * jax.random.normal(k[1], (1,), jnp.float32),
        "bn_var": jnp.abs(jax.random.normal(k[2], (1,), jnp.float32)) + 0.5,
        "lin_w": 0.05 * jax.random.normal(k[3], (hw + 1, hw), jnp.float32),
        "lin_b": 0.01 * jax.random.normal(k[4], (hw + 1,), jnp.float32),
    }


if __name__ == "__main__":
    batch, channels, board_size = 2, 4, 16
    key = jax.random.PRNGKey(0)
    kx, kp = jax.random.split(key)

    x = jax.random.normal(kx, (batch, channels, board_size, board_size), jnp.float32)
    params = make_params(kp, channels, board_size)
    ref = reference_forward(x, params)

    # f32 MXU-operand path: tight check against the reference.
    prepped_f32 = prepare_policy_head_params(params, matmul_dtype=jnp.float32)
    out_f32 = jax.block_until_ready(policy_head_forward(x, prepped_f32))
    assert out_f32.shape == (batch, board_size * board_size + 1)
    assert jnp.allclose(out_f32, ref, atol=1e-4, rtol=1e-4), "f32 path mismatch vs reference"

    # Default bf16 MXU-operand path (f32 accumulate) -- production config on
    # all generations (v5e/v6e/v7x MXUs take bf16 operands natively).
    prepped = prepare_policy_head_params(params)
    out = jax.block_until_ready(policy_head_forward(x, prepped))
    assert out.shape == (batch, board_size * board_size + 1)
    assert jnp.allclose(out, ref, atol=5e-2, rtol=5e-2), "bf16 path mismatch vs reference"

    # Also exercise the column-parallel (dual-TensorCore / v7x) grid path.
    out_cp = jax.block_until_ready(policy_head_forward(x, prepped, col_parallel=True))
    assert jnp.allclose(out_cp, ref, atol=5e-2, rtol=5e-2), "column-parallel path mismatch"

    print("KERNEL_OK")
</pallas_src>

<mosaic_0001>
module attributes {stable_mosaic.version = 11 : i64} {
  func.func @policy_head_kernel(%arg0: i32, %arg1: i32, %arg2: memref<1x5xf32, #tpu.memory_space<smem>>, %arg3: memref<2x1024xf32, #tpu.memory_space<vmem>>, %arg4: memref<256x384xf32, #tpu.memory_space<vmem>>, %arg5: memref<1x384xf32, #tpu.memory_space<vmem>>, %arg6: memref<2x384xf32, #tpu.memory_space<vmem>>) attributes {dimension_semantics = [#tpu.dimension_semantics<parallel>, #tpu.dimension_semantics<parallel>], iteration_bounds = array<i64: 1, 1>, scalar_prefetch = 0 : i64, scratch_operands = 0 : i64, tpu.core_type = #tpu.core_type<tc>, window_params = [{transform_indices = @transform_0, window_bounds = array<i64: 1, 5>}, {transform_indices = @transform_1, window_bounds = array<i64: 2, 1024>}, {transform_indices = @transform_2, window_bounds = array<i64: 256, 384>}, {transform_indices = @transform_3, window_bounds = array<i64: 1, 384>}, {transform_indices = @transform_4, window_bounds = array<i64: 2, 384>}]} {
    %c0 = arith.constant 0 : index
    %c0_0 = arith.constant 0 : index
    %0 = vector.load %arg3[%c0, %c0_0] : memref<2x1024xf32, #tpu.memory_space<vmem>>, vector<2x256xf32>
    %c0_1 = arith.constant 0 : index
    %c0_2 = arith.constant 0 : index
    %1 = memref.load %arg2[%c0_1, %c0_2] : memref<1x5xf32, #tpu.memory_space<smem>>
    %2 = vector.broadcast %1 : f32 to vector<2x256xf32>
    %3 = arith.mulf %0, %2 : vector<2x256xf32>
    %c0_3 = arith.constant 0 : index
    %c256 = arith.constant 256 : index
    %4 = vector.load %arg3[%c0_3, %c256] : memref<2x1024xf32, #tpu.memory_space<vmem>>, vector<2x256xf32>
    %c0_4 = arith.constant 0 : index
    %c1 = arith.constant 1 : index
    %5 = memref.load %arg2[%c0_4, %c1] : memref<1x5xf32, #tpu.memory_space<smem>>
    %6 = vector.broadcast %5 : f32 to vector<2x256xf32>
    %7 = arith.mulf %4, %6 : vector<2x256xf32>
    %c0_5 = arith.constant 0 : index
    %c512 = arith.constant 512 : index
    %8 = vector.load %arg3[%c0_5, %c512] : memref<2x1024xf32, #tpu.memory_space<vmem>>, vector<2x256xf32>
    %c0_6 = arith.constant 0 : index
    %c2 = arith.constant 2 : index
    %9 = memref.load %arg2[%c0_6, %c2] : memref<1x5xf32, #tpu.memory_space<smem>>
    %10 = vector.broadcast %9 : f32 to vector<2x256xf32>
    %11 = arith.mulf %8, %10 : vector<2x256xf32>
    %c0_7 = arith.constant 0 : index
    %c768 = arith.constant 768 : index
    %12 = vector.load %arg3[%c0_7, %c768] : memref<2x1024xf32, #tpu.memory_space<vmem>>, vector<2x256xf32>
    %c0_8 = arith.constant 0 : index
    %c3 = arith.constant 3 : index
    %13 = memref.load %arg2[%c0_8, %c3] : memref<1x5xf32, #tpu.memory_space<smem>>
    %14 = vector.broadcast %13 : f32 to vector<2x256xf32>
    %15 = arith.mulf %12, %14 : vector<2x256xf32>
    %16 = arith.addf %3, %7 : vector<2x256xf32>
    %17 = arith.addf %16, %11 : vector<2x256xf32>
    %18 = arith.addf %17, %15 : vector<2x256xf32>
    %c0_9 = arith.constant 0 : index
    %c4 = arith.constant 4 : index
    %19 = memref.load %arg2[%c0_9, %c4] : memref<1x5xf32, #tpu.memory_space<smem>>
    %20 = vector.broadcast %19 : f32 to vector<2x256xf32>
    %21 = arith.addf %18, %20 : vector<2x256xf32>
    %cst = arith.constant 0.000000e+00 : f32
    %22 = vector.broadcast %cst : f32 to vector<2x256xf32>
    %23 = arith.maximumf %21, %22 : vector<2x256xf32>
    %c0_10 = arith.constant 0 : index
    %c0_11 = arith.constant 0 : index
    %24 = vector.load %arg4[%c0_10, %c0_11] : memref<256x384xf32, #tpu.memory_space<vmem>>, vector<256x384xf32>
    %cst_12 = arith.constant dense<0.000000e+00> : vector<2x384xf32>
    %25 = tpu.matmul %23, %24, %cst_12 {dimension_numbers = #tpu.dot_dimension_numbers<[1], [0], [0], [1], [0, 0, 1, 1], [], []>} : vector<2x256xf32>, vector<256x384xf32>, vector<2x384xf32> -> vector<2x384xf32>
    %c0_13 = arith.constant 0 : index
    %c0_14 = arith.constant 0 : index
    %26 = vector.load %arg5[%c0_13, %c0_14] : memref<1x384xf32, #tpu.memory_space<vmem>>, vector<1x384xf32>
    %27 = vector.broadcast %26 : vector<1x384xf32> to vector<2x384xf32>
    %28 = arith.addf %25, %27 : vector<2x384xf32>
    %c0_15 = arith.constant 0 : index
    %c0_16 = arith.constant 0 : index
    %29 = vector.load %arg6[%c0_15, %c0_16] : memref<2x384xf32, #tpu.memory_space<vmem>>, vector<2x384xf32>
    tpu.vector_store %arg6[%c0_15, %c0_16], %28 {strides = array<i32>} : memref<2x384xf32, #tpu.memory_space<vmem>>, vector<2x384xf32>,
    return
  }
  func.func @transform_0(%arg0: i32, %arg1: i32) -> (i32, i32) {
    %c0_i32 = arith.constant 0 : i32
    %c0_i32_0 = arith.constant 0 : i32
    %c0_i32_1 = arith.constant 0 : i32
    return %c0_i32, %c0_i32_0 : i32, i32
  }
  func.func @transform_1(%arg0: i32, %arg1: i32) -> (i32, i32) {
    %c0_i32 = arith.constant 0 : i32
    %c0_i32_0 = arith.constant 0 : i32
    return %arg0, %c0_i32 : i32, i32
  }
  func.func @transform_2(%arg0: i32, %arg1: i32) -> (i32, i32) {
    %c0_i32 = arith.constant 0 : i32
    %c0_i32_0 = arith.constant 0 : i32
    return %c0_i32, %arg1 : i32, i32
  }
  func.func @transform_3(%arg0: i32, %arg1: i32) -> (i32, i32) {
    %c0_i32 = arith.constant 0 : i32
    %c0_i32_0 = arith.constant 0 : i32
    return %c0_i32, %arg1 : i32, i32
  }
  func.func @transform_4(%arg0: i32, %arg1: i32) -> (i32, i32) {
    %c0_i32 = arith.constant 0 : i32
    return %arg0, %arg1 : i32, i32
  }
}

</mosaic_0001>

<bundles_post_ra>
// kernel: tpu_custom_call.1
= control target key start
LH: loop header
LB: loop body
LE: loop exit
PB: predicated region body
PF: predicated region fallthrough
CT: control target
= control target key end

     0   :  { %9 = vsyncpa [#allocation5], 0  ;;  %s546_s0 = inlined_call_operand.hbm [shape: f32[1,5], index: 0, kind: input, shape index: {}]   ;;  %s547_s1 = inlined_call_operand.hbm [shape: f32[2,1024], index: 1, kind: input, shape index: {}]   ;;  %s548_s2 = inlined_call_operand.hbm [shape: f32[256,384], index: 2, kind: input, shape index: {}]   ;;  %s549_s3 = inlined_call_operand.hbm [shape: f32[1,384], index: 3, kind: input, shape index: {}]   ;;  %s550_s4 = inlined_call_operand.hbm [shape: f32[2,384], index: 4, kind: output, shape index: {}]  }
   0x1   :  { %10 = vsyncpa [#allocation3], 0 }
   0x2   :  { %11 = vsyncpa [#allocation8], 0  ;;  %s37_s17 = sshll.u32 %s548_s2, 4  ;;  %s38_s17 = int_to_ptr.hbm [resolvable:$true] %s37_s17 }
   0x3   :  { %12 = vsyncpa [#allocation4], 0  ;;  %s484_s18 = smov [#allocation7]   ;;  %s18_s22 = sshll.u32 %s546_s0, 4  ;;  %s19_s22 = int_to_ptr.hbm [resolvable:$true] %s18_s22 }
   0x4   :  { %s39_s19 = sshll.u32 %s484_s18, 4  ;;  %s485_s23 = smov 384   ;;  %s40_s19 = int_to_ptr.vmem [resolvable:$true] %s39_s19 }
   0x5   :  { %s486_s24 = smov 24   ;;  %s487_s25 = smov [#allocation2]  }
   0x6   :  { %45 = dma.hbm_to_vmem [thread:$0]  %s38_s17, 12288, %s40_s19, [#allocation8], %s485_s23, %s485_s23, %s486_s24  }
   0x7   :  { %21 = dma.hbm_to_smem %s19_s22, 16, %s487_s25, [#allocation5]  }
   0x8   :  { %s27_s28 = sshll.u32 %s547_s1, 4  ;;  %s488_s2 = smov [#allocation6]   ;;  %s28_s28 = int_to_ptr.hbm [resolvable:$true] %s27_s28 }
   0x9   :  { %s29_s29 = sshll.u32 %s488_s2, 4  ;;  %s51_s6 = sshll.u32 %s549_s3, 4  ;;  %s30_s29 = int_to_ptr.vmem [resolvable:$true] %s29_s29  ;;  %s52_s6 = int_to_ptr.hbm [resolvable:$true] %s51_s6 }
   0xa   :  { %32 = dma.hbm_to_vmem [thread:$0]  %s28_s28, 256, %s30_s29, [#allocation3]  }
   0xb   :  { %s489_s0 = smov [#allocation9]  }
   0xc   :  { %s53_s7 = sshll.u32 %s489_s0, 4  ;;  %s54_s7 = int_to_ptr.vmem [resolvable:$true] %s53_s7 }
   0xd   :  { %56 = dma.hbm_to_vmem [thread:$0]  %s52_s6, 48, %s54_s7, [#allocation8]  }
   0xe   :  { %476 = dma.done.wait [#allocation5], 16  }
   0xf   :  { %477 = vsyncadd [#allocation5], 4294967280 }
  0x10   :  { %478 = dma.done.wait [#allocation3], 256  }
  0x11   :  { %479 = vsyncadd [#allocation3], 4294967040 }
  0x12   :  { %480 = dma.done.wait [#allocation8], 12336  }
  0x13   :  { %481 = vsyncadd [#allocation8], 4294954960 }
  0x14   :  { %73 = sfence }
  0x15   :  { %v142_v0 = vld [vmem:[#allocation7 + $0x168] sm:$0xff]  ;;  %v139_v1 = vld [vmem:[#allocation7 + $0x150] sm:$0xff]  ;;  %v136_v4 = vld [vmem:[#allocation7 + $0x138] sm:$0xff]  ;;  %s528_s1 = sld [smem:[#allocation2]]  ;;  %vm332_vm0 = vcmask 1041408   ;;  %s490_s11 = smov [#allocation10]  }
  0x16   :  { %v190_v2 = vld [vmem:[#allocation7 + $0x2e8] sm:$0xff]  ;;  %207 = vmatpush.msra.mxu0 %v142_v0  ;;  %v187_v3 = vld [vmem:[#allocation7 + $0x2d0] sm:$0xff]  ;;  %v184_v5 = vld [vmem:[#allocation7 + $0x2b8] sm:$0xff]  ;;  %s530_s3 = sld [smem:[#allocation2 + $0x1]]  ;;  %s343_s12 = sshll.u32 %s490_s11, 4  ;;  %vm334_vm1 = vcmask 1043456   ;;  %s344_s12 = int_to_ptr.vmem [resolvable:$true] %s343_s12 }
  0x17   :  { %227 = vmatpush.msra.mxu1 %v190_v2  ;;  %v133_v6 = vld [vmem:[#allocation7 + $0x120] sm:$0xff]  ;;  %v130_v8 = vld [vmem:[#allocation7 + $0x108] sm:$0xff]  ;;  %v143_v9 = vld [vmem:[#allocation7 + $0x170] sm:$0xff]  ;;  %s532_s8 = sld [smem:[#allocation2 + $0x2]]  ;;  %s345_s15 = sshll.u32 %s550_s4, 4  ;;  %s346_s15 = int_to_ptr.hbm [resolvable:$true] %s345_s15 }
  0x18   :  { %208 = vmatpush.msra.mxu0 %v139_v1  ;;  %v181_v7 = vld [vmem:[#allocation7 + $0x2a0] sm:$0xff]  ;;  %v178_v10 = vld [vmem:[#allocation7 + $0x288] sm:$0xff]  ;;  %247 = vmatpush.msra.mxu2 %v143_v9  ;;  %v140_v11 = vld [vmem:[#allocation7 + $0x158] sm:$0xff]  ;;  %s534_s9 = sld [smem:[#allocation2 + $0x3]] }
  0x19   :  { %228 = vmatpush.msra.mxu1 %v187_v3  ;;  %v191_v12 = vld [vmem:[#allocation7 + $0x2f0] sm:$0xff]  ;;  %v137_v13 = vld [vmem:[#allocation7 + $0x140] sm:$0xff]  ;;  %v188_v14 = vld [vmem:[#allocation7 + $0x2d8] sm:$0xff]  ;;  %s539_s10 = sld [smem:[#allocation2 + $0x4]] }
  0x1a   :  { %209 = vmatpush.msra.mxu0 %v136_v4  ;;  %v127_v15 = vld [vmem:[#allocation7 + $0xf0] sm:$0xff]  ;;  %248 = vmatpush.msra.mxu2 %v140_v11  ;;  %v134_v17 = vld [vmem:[#allocation7 + $0x128] sm:$0xff]  ;;  %v185_v18 = vld [vmem:[#allocation7 + $0x2c0] sm:$0xff] }
  0x1b   :  { %229 = vmatpush.msra.mxu1 %v184_v5  ;;  %v175_v16 = vld [vmem:[#allocation7 + $0x270] sm:$0xff]  ;;  %267 = vmatpush.msra.mxu3 %v191_v12  ;;  %v124_v19 = vld [vmem:[#allocation7 + $0xd8] sm:$0xff]  ;;  %v182_v22 = vld [vmem:[#allocation7 + $0x2a8] sm:$0xff]  ;;  %v76_v50 = vstv %s528_s1 }
  0x1c   :  { %210 = vmatpush.msra.mxu0 %v133_v6  ;;  %v172_v20 = vld [vmem:[#allocation7 + $0x258] sm:$0xff]  ;;  %249 = vmatpush.msra.mxu2 %v137_v13  ;;  %v131_v21 = vld [vmem:[#allocation7 + $0x110] sm:$0xff]  ;;  %v121_v23 = vld [vmem:[#allocation7 + $0xc0] sm:$0xff]  ;;  %v80_v51 = vstv %s530_s3 }
  0x1d   :  { %230 = vmatpush.msra.mxu1 %v181_v7  ;;  %268 = vmatpush.msra.mxu3 %v188_v14  ;;  %v169_v24 = vld [vmem:[#allocation7 + $0x240] sm:$0xff]  ;;  %v128_v25 = vld [vmem:[#allocation7 + $0xf8] sm:$0xff]  ;;  %v179_v26 = vld [vmem:[#allocation7 + $0x290] sm:$0xff]  ;;  %v84_v52 = vstv %s532_s8 }
  0x1e   :  { %211 = vmatpush.msra.mxu0 %v130_v8  ;;  %250 = vmatpush.msra.mxu2 %v134_v17  ;;  %v118_v27 = vld [vmem:[#allocation7 + $0xa8] sm:$0xff]  ;;  %v125_v29 = vld [vmem:[#allocation7 + $0xe0] sm:$0xff]  ;;  %v176_v30 = vld [vmem:[#allocation7 + $0x278] sm:$0xff]  ;;  %v88_v59 = vstv %s534_s9 }
  0x1f   :  { %231 = vmatpush.msra.mxu1 %v178_v10  ;;  %269 = vmatpush.msra.mxu3 %v185_v18  ;;  %v166_v28 = vld [vmem:[#allocation7 + $0x228] sm:$0xff]  ;;  %v115_v31 = vld [vmem:[#allocation7 + $0x90] sm:$0xff]  ;;  %v173_v34 = vld [vmem:[#allocation7 + $0x260] sm:$0xff] }
  0x20   :  { %212 = vmatpush.msra.mxu0 %v127_v15  ;;  %251 = vmatpush.msra.mxu2 %v131_v21  ;;  %v163_v32 = vld [vmem:[#allocation7 + $0x210] sm:$0xff]  ;;  %v122_v33 = vld [vmem:[#allocation7 + $0xc8] sm:$0xff]  ;;  %v112_v35 = vld [vmem:[#allocation7 + $0x78] sm:$0xff]  ;;  %v94_v15 = vstv %s539_s10 }
  0x21   :  { %232 = vmatpush.msra.mxu1 %v175_v16  ;;  %270 = vmatpush.msra.mxu3 %v182_v22  ;;  %v160_v36 = vld [vmem:[#allocation7 + $0x1f8] sm:$0xff]  ;;  %v119_v37 = vld [vmem:[#allocation7 + $0xb0] sm:$0xff]  ;;  %v170_v38 = vld [vmem:[#allocation7 + $0x248] sm:$0xff] }
  0x22   :  { %213 = vmatpush.msra.mxu0 %v124_v19  ;;  %252 = vmatpush.msra.mxu2 %v128_v25  ;;  %v109_v39 = vld [vmem:[#allocation7 + $0x60] sm:$0xff]  ;;  %v116_v41 = vld [vmem:[#allocation7 + $0x98] sm:$0xff]  ;;  %v167_v42 = vld [vmem:[#allocation7 + $0x230] sm:$0xff] }
  0x23   :  { %233 = vmatpush.msra.mxu1 %v172_v20  ;;  %271 = vmatpush.msra.mxu3 %v179_v26  ;;  %v157_v40 = vld [vmem:[#allocation7 + $0x1e0] sm:$0xff]  ;;  %v106_v43 = vld [vmem:[#allocation7 + $0x48] sm:$0xff]  ;;  %v164_v46 = vld [vmem:[#allocation7 + $0x218] sm:$0xff] }
  0x24   :  { %214 = vmatpush.msra.mxu0 %v121_v23  ;;  %253 = vmatpush.msra.mxu2 %v125_v29  ;;  %v154_v44 = vld [vmem:[#allocation7 + $0x1c8] sm:$0xff]  ;;  %v113_v45 = vld [vmem:[#allocation7 + $0x80] sm:$0xff]  ;;  %v103_v47 = vld [vmem:[#allocation7 + $0x30] sm:$0xff] }
  0x25   :  { %234 = vmatpush.msra.mxu1 %v169_v24  ;;  %272 = vmatpush.msra.mxu3 %v176_v30  ;;  %v100_v48 = vld [vmem:[#allocation7 + $0x18] sm:$0xff]  ;;  %v151_v49 = vld [vmem:[#allocation7 + $0x1b0] sm:$0xff]  ;;  %v110_v54 = vld [vmem:[#allocation7 + $0x68] sm:$0xff] }
  0x26   :  { %215 = vmatpush.msra.mxu0 %v118_v27  ;;  %254 = vmatpush.msra.mxu2 %v122_v33  ;;  %v148_v53 = vld [vmem:[#allocation7 + $0x198] sm:$0xff]  ;;  %v161_v55 = vld [vmem:[#allocation7 + $0x200] sm:$0xff]  ;;  %v74_v56 = vld [vmem:[#allocation6] sm:$0xf] }
  0x27   :  { %235 = vmatpush.msra.mxu1 %v166_v28  ;;  %273 = vmatpush.msra.mxu3 %v173_v34  ;;  %v78_v57 = vld [vmem:[#allocation6 + $0x4] sm:$0xf]  ;;  %v82_v58 = vld [vmem:[#allocation6 + $0x8] sm:$0xf]  ;;  %v158_v61 = vld [vmem:[#allocation7 + $0x1e8] sm:$0xff]  ;;  %v77_v62 = vmul.f32 %v76_v50, %v74_v56 }
  0x28   :  { %216 = vmatpush.msra.mxu0 %v115_v31  ;;  %255 = vmatpush.msra.mxu2 %v119_v37  ;;  %v107_v60 = vld [vmem:[#allocation7 + $0x50] sm:$0xff]  ;;  %v81_v63 = vmul.f32 %v80_v51, %v78_v57  ;;  %v85_v0 = vmul.f32 %v84_v52, %v82_v58  ;;  %v86_v1 = vld [vmem:[#allocation6 + $0xc] sm:$0xf]  ;;  %v97_v2 = vld [vmem:[#allocation7] sm:$0xff] }
  0x29   :  { %236 = vmatpush.msra.mxu1 %v163_v32  ;;  %274 = vmatpush.msra.mxu3 %v170_v38  ;;  %v145_v3 = vld [vmem:[#allocation7 + $0x180] sm:$0xff]  ;;  %v144_v4 = vld [vmem:[#allocation7 + $0x178] sm:$0xff]  ;;  %v89_v6 = vmul.f32 %v88_v59, %v86_v1  ;;  %v155_v9 = vld [vmem:[#allocation7 + $0x1d0] sm:$0xff] }
  0x2a   :  { %217 = vmatpush.msra.mxu0 %v112_v35  ;;  %256 = vmatpush.msra.mxu2 %v116_v41  ;;  %v192_v5 = vld [vmem:[#allocation7 + $0x2f8] sm:$0xff]  ;;  %v90_v7 = vadd.f32 %v81_v63, %v77_v62  ;;  %v141_v10 = vld [vmem:[#allocation7 + $0x160] sm:$0xff]  ;;  %v138_v16 = vld [vmem:[#allocation7 + $0x148] sm:$0xff] }
  0x2b   :  { %237 = vmatpush.msra.mxu1 %v160_v36  ;;  %275 = vmatpush.msra.mxu3 %v167_v42  ;;  %v104_v8 = vld [vmem:[#allocation7 + $0x38] sm:$0xff]  ;;  %v189_v11 = vld [vmem:[#allocation7 + $0x2e0] sm:$0xff]  ;;  %v186_v17 = vld [vmem:[#allocation7 + $0x2c8] sm:$0xff] }
  0x2c   :  { %218 = vmatpush.msra.mxu0 %v109_v39  ;;  %257 = vmatpush.msra.mxu2 %v113_v45  ;;  %v91_v12 = vadd.f32 %v90_v7, %v85_v0  ;;  %v101_v13 = vld [vmem:[#allocation7 + $0x20] sm:$0xff]  ;;  %v152_v14 = vld [vmem:[#allocation7 + $0x1b8] sm:$0xff]  ;;  %v98_v19 = vld [vmem:[#allocation7 + $0x8] sm:$0xff] }
  0x2d   :  { %238 = vmatpush.msra.mxu1 %v157_v40  ;;  %276 = vmatpush.msra.mxu3 %v164_v46  ;;  %v149_v20 = vld [vmem:[#allocation7 + $0x1a0] sm:$0xff]  ;;  %v135_v21 = vld [vmem:[#allocation7 + $0x130] sm:$0xff]  ;;  %v146_v24 = vld [vmem:[#allocation7 + $0x188] sm:$0xff] }
  0x2e   :  { %219 = vmatpush.msra.mxu0 %v106_v43  ;;  %258 = vmatpush.msra.mxu2 %v110_v54  ;;  %v92_v18 = vadd.f32 %v91_v12, %v89_v6  ;;  %v183_v22 = vld [vmem:[#allocation7 + $0x2b0] sm:$0xff]  ;;  %v132_v25 = vld [vmem:[#allocation7 + $0x118] sm:$0xff]  ;;  %v129_v28 = vld [vmem:[#allocation7 + $0x100] sm:$0xff] }
  0x2f   :  { %239 = vmatpush.msra.mxu1 %v154_v44  ;;  %277 = vmatpush.msra.mxu3 %v161_v55  ;;  %v180_v26 = vld [vmem:[#allocation7 + $0x298] sm:$0xff]  ;;  %v177_v29 = vld [vmem:[#allocation7 + $0x280] sm:$0xff]  ;;  %v126_v30 = vld [vmem:[#allocation7 + $0xe8] sm:$0xff] }
  0x30   :  { %220 = vmatpush.msra.mxu0 %v103_v47  ;;  %259 = vmatpush.msra.mxu2 %v107_v60  ;;  %v95_v23 = vadd.f32 %v94_v15, %v92_v18  ;;  %v174_v31 = vld [vmem:[#allocation7 + $0x268] sm:$0xff]  ;;  %v123_v32 = vld [vmem:[#allocation7 + $0xd0] sm:$0xff]  ;;  %v120_v34 = vld [vmem:[#allocation7 + $0xb8] sm:$0xff] }
  0x31   :  { %240 = vmatpush.msra.mxu1 %v151_v49  ;;  %278 = vmatpush.msra.mxu3 %v158_v61  ;;  %v171_v33 = vld [vmem:[#allocation7 + $0x250] sm:$0xff]  ;;  %v168_v35 = vld [vmem:[#allocation7 + $0x238] sm:$0xff]  ;;  %v117_v38 = vld [vmem:[#allocation7 + $0xa0] sm:$0xff] }
  0x32   :  { %221 = vmatpush.msra.mxu0 %v100_v48  ;;  %260 = vmatpush.msra.mxu2 %v104_v8  ;;  %v96_v27 = vmax.f32 %v95_v23, 0.0  ;;  %v165_v39 = vld [vmem:[#allocation7 + $0x220] sm:$0xff]  ;;  %v114_v40 = vld [vmem:[#allocation7 + $0x88] sm:$0xff]  ;;  %v111_v42 = vld [vmem:[#allocation7 + $0x70] sm:$0xff] }
  0x33   :  { %241 = vmatpush.msra.mxu1 %v148_v53  ;;  %279 = vmatpush.msra.mxu3 %v155_v9  ;;  %v162_v41 = vld [vmem:[#allocation7 + $0x208] sm:$0xff]  ;;  %v159_v43 = vld [vmem:[#allocation7 + $0x1f0] sm:$0xff]  ;;  %v108_v44 = vld [vmem:[#allocation7 + $0x58] sm:$0xff] }
  0x34   :  { %222 = vmatpush.msra.mxu0 %v97_v2  ;;  %261 = vmatpush.msra.mxu2 %v101_v13  ;;  %202 = vst [vmem:[#allocation1] ss:$4 sm:$0xff] %v96_v27  ;;  %v156_v45 = vld [vmem:[#allocation7 + $0x1d8] sm:$0xff]  ;;  %v105_v46 = vld [vmem:[#allocation7 + $0x40] sm:$0xff]  ;;  %v102_v48 = vld [vmem:[#allocation7 + $0x28] sm:$0xff] }
  0x35   :  { %242 = vmatpush.msra.mxu1 %v145_v3  ;;  %280 = vmatpush.msra.mxu3 %v152_v14  ;;  %v153_v47 = vld [vmem:[#allocation7 + $0x1c0] sm:$0xff]  ;;  %v150_v49 = vld [vmem:[#allocation7 + $0x1a8] sm:$0xff]  ;;  %v99_v50 = vld [vmem:[#allocation7 + $0x10] sm:$0xff] }
  0x36   :  { %287 = vmatpush.msrb.mxu0 %v144_v4  ;;  %262 = vmatpush.msra.mxu2 %v98_v19  ;;  %v147_v51 = vld [vmem:[#allocation7 + $0x190] sm:$0xff]  ;;  %v193_v52 = vld [vmem:[#allocation9] sm:$0x7] }
  0x37   :  { %307 = vmatpush.msrb.mxu1 %v192_v5  ;;  %281 = vmatpush.msra.mxu3 %v149_v20  ;;  %v196_v53 = vperm.slane %v193_v52, 1  ;;  %v195_v58 = vperm.slane %v193_v52, 0  ;;  %v197_v60 = vperm.slane %v193_v52, 2 }
  0x38   :  { %288 = vmatpush.msrb.mxu0 %v141_v10 }
  0x39   :  { %308 = vmatpush.msrb.mxu1 %v189_v11  ;;  %282 = vmatpush.msra.mxu3 %v146_v24 }
  0x3a   :  { %289 = vmatpush.msrb.mxu0 %v138_v16 }
  0x3b   :  { %309 = vmatpush.msrb.mxu1 %v186_v17  ;;  %v203_v36 = vld.sshfl [vmem:[#allocation1] sm:$0xff pattern:$0x73625140]  ;;  %v204_v37 = vld.sshfl [vmem:[#allocation1 + $0x8] sm:$0xff pattern:$0x73625140] }
  0x3c   :  { %290 = vmatpush.msrb.mxu0 %v135_v21  ;;  %263 = vmatmul.f32.vlgmr.msra.gmra.mxu2 %v203_v36 }
  0x3d   :  { %310 = vmatpush.msrb.mxu1 %v183_v22  ;;  %283 = vmatmul.f32.vlgmr.msra.gmra.mxu3 %v204_v37 }
  0x3e   :  { %291 = vmatpush.msrb.mxu0 %v132_v25  ;;  %243 = vmatmul.f32.vlgmr.msra.gmra.mxu1 %v204_v37 }
  0x3f   :  { %311 = vmatpush.msrb.mxu1 %v180_v26  ;;  %223 = vmatmul.f32.vlgmr.msra.gmra.mxu0 %v203_v36 }
  0x40   :  { %292 = vmatpush.msrb.mxu0 %v129_v28 }
  0x41   :  { %312 = vmatpush.msrb.mxu1 %v177_v29 }
  0x42   :  { %293 = vmatpush.msrb.mxu0 %v126_v30 }
  0x43   :  { %313 = vmatpush.msrb.mxu1 %v174_v31 }
  0x44   :  { %294 = vmatpush.msrb.mxu0 %v123_v32 }
  0x45   :  { %314 = vmatpush.msrb.mxu1 %v171_v33 }
  0x46   :  { %295 = vmatpush.msrb.mxu0 %v120_v34 }
  0x47   :  { %315 = vmatpush.msrb.mxu1 %v168_v35 }
  0x48   :  { %296 = vmatpush.msrb.mxu0 %v117_v38 }
  0x49   :  { %316 = vmatpush.msrb.mxu1 %v165_v39 }
  0x4a   :  { %297 = vmatpush.msrb.mxu0 %v114_v40 }
  0x4b   :  { %317 = vmatpush.msrb.mxu1 %v162_v41 }
  0x4c   :  { %298 = vmatpush.msrb.mxu0 %v111_v42 }
  0x4d   :  { %318 = vmatpush.msrb.mxu1 %v159_v43 }
  0x4e   :  { %299 = vmatpush.msrb.mxu0 %v108_v44 }
  0x4f   :  { %319 = vmatpush.msrb.mxu1 %v156_v45 }
  0x50   :  { %300 = vmatpush.msrb.mxu0 %v105_v46 }
  0x51   :  { %320 = vmatpush.msrb.mxu1 %v153_v47 }
  0x52   :  { %301 = vmatpush.msrb.mxu0 %v102_v48 }
  0x53   :  { %321 = vmatpush.msrb.mxu1 %v150_v49 }
  0x54   :  { %302 = vmatpush.msrb.mxu0 %v99_v50 }
  0x55   :  { %322 = vmatpush.msrb.mxu1 %v147_v51  ;;  %303 = vmatmul.f32.vlgmr.msrb.gmra.mxu0 %v203_v36 }
  0x56   :  { %323 = vmatmul.f32.vlgmr.msrb.gmra.mxu1 %v204_v37 }
  0xbb   :  { %v244_v55 = vpop.f32.mrf.mxu1 }
  0xbc   :  { %v224_v54 = vpop.f32.mrf.mxu0 }
  0xbd   :  { %v225_v61 = vadd.f32 %v224_v54, %v195_v58 }
  0xbf   :  { %v264_v56 = vpop.f32.mrf.mxu2  ;;  %v245_v3 = vadd.f32 %v244_v55, %v225_v61 }
  0xc0   :  { %v265_v57 = vadd.f32 %v264_v56, %v196_v53  ;;  %v284_v59 = vpop.f32.mrf.mxu3 }
  0xc2   :  { %v285_v62 = vadd.f32 %v284_v59, %v265_v57 }
  0xc4   :  { %v330_v2 = vrot.slane %v285_v62, 6 }
  0xc6   :  { %v333_v6 = vsel %vm332_vm0, %v245_v3, %v330_v2 }
  0xd2   :  { %v304_v63 = vpop.f32.mrf.mxu0 }
  0xd3   :  { %v324_v0 = vpop.f32.mrf.mxu1  ;;  %v305_v1 = vadd.f32 %v304_v63, %v197_v60 }
  0xd5   :  { %v325_v4 = vadd.f32 %v324_v0, %v305_v1 }
  0xd7   :  { %v331_v5 = vrot.slane %v325_v4, 4 }
  0xd9   :  { %v335_v7 = vsel %vm334_vm1, %v333_v6, %v331_v5 }
  0xda   :  { %337 = vst [vmem:[#allocation10] sm:$0x3f] %v335_v7 }
  0xdb   :  { %348 = dma.vmem_to_hbm [thread:$0]  %s344_s12, 96, %s346_s15, [#allocation4]  }
  0xdc   :  { %482 = dma.done.wait [#allocation4], 96  }
  0xdd   :  { %483 = vsyncadd [#allocation4], 4294967200 }
  0xde   :  { %353 = vsyncpa [#allocation3], 1 }
  0xdf   :  { %354 = vsyncpa [#allocation8], 1 }
  0xe0   :  { %355 = vsyncpa [#allocation4], 1 }
  0xe1   :  { %356 = vsyncpa [#allocation5], 1 }

</bundles_post_ra>
